<compile_context>
chip_gen: v7x
topology: tpu7x:2x2x1
jax: 0.10.0
libtpu: 0.0.40
codegen_flags: <defaults>
</compile_context>

<pallas_src>
import functools

import jax
import jax.numpy as jnp
from jax import lax
from jax.experimental import pallas as pl
from jax.experimental.pallas import tpu as pltpu


def _tap(x, ky, kx, col, H, W):
    """Shifted view of the flat image: lane i of the result holds
    x[:, i + ky*W + kx] (i.e. pixel (h+ky, w+kx) for i = h*W + w), with zeros
    where the source pixel falls outside the image (the conv's zero padding).

    Implemented with static lane slices + zero fill; positions whose source
    column wrapped across an image row are masked out with `col`.
    (For large W*C this shift can be done with pltpu.roll on the XLU instead.)
    """
    HW = H * W
    off = ky * W + kx
    if off == 0:
        shifted = x
    elif off > 0:
        z = jnp.zeros((x.shape[0], off), dtype=x.dtype)
        shifted = jnp.concatenate([x[:, off:], z], axis=1)
    else:
        z = jnp.zeros((x.shape[0], -off), dtype=x.dtype)
        shifted = jnp.concatenate([z, x[:, : HW + off]], axis=1)

    if kx == -1:
        shifted = jnp.where(col >= 1, shifted, jnp.zeros_like(shifted))
    elif kx == 1:
        shifted = jnp.where(col < W - 1, shifted, jnp.zeros_like(shifted))
    return shifted


def _resblock_kernel(x_ref, w_ref, b_ref, out_ref, *, H, W, Cin, Cout, mxu_dtype):
    # x_ref  : (1, Cin, H*W)     flattened image, lane-dense (one batch element)
    # w_ref  : (Cout, 9*Cin)     conv weights, taps folded into K
    # b_ref  : (Cout, 1)         conv bias (broadcasts over lanes)
    # out_ref: (1, Cout, H*W)    lane-dense output
    HW = H * W
    x = x_ref[0]                                            # (Cin, H*W)

    # Column index of every lane (flat index i = h*W + w  ->  w = i % W).
    col = lax.broadcasted_iota(jnp.int32, (1, HW), 1) % W

    # im2col in flat space: one (9*Cin, H*W) patch matrix, K ordered (dy, dx, ci)
    # to match the wrapper-side weight reshape.
    taps = []
    for dy in range(3):
        for dx in range(3):
            taps.append(_tap(x, dy - 1, dx - 1, col, H, W))
    patches = jnp.concatenate(taps, axis=0)                 # (9*Cin, H*W)

    lhs = w_ref[...]                                        # (Cout, 9*Cin)
    rhs = patches
    if mxu_dtype is not None:                               # bf16 MXU on v6e/v7x
        lhs = lhs.astype(mxu_dtype)
        rhs = rhs.astype(mxu_dtype)

    acc = lax.dot_general(                                  # single matmul, K = 9*Cin
        lhs, rhs,
        dimension_numbers=(((1,), (0,)), ((), ())),
        preferred_element_type=jnp.float32,
    )                                                       # (Cout, H*W) f32

    acc = jnp.maximum(acc + b_ref[...], 0.0)                # bias + ReLU (f32, VPU)
    out = acc + x.astype(jnp.float32)                       # residual add (same buffer)
    out_ref[0] = out.astype(out_ref.dtype)                  # unmasked lane-dense store


def resblock_pallas(x_nchw, weight_hwio, bias, *, mxu_dtype=None):
    """ResBlock forward: relu(conv3x3(x) + b) + x.

    x_nchw: (N, C, H, W); weight_hwio: (3, 3, Cin, Cout); bias: (Cout,).
    Requires Cin == Cout == C (residual add), as in the PyTorch module.
    """
    N, C, H, W = x_nchw.shape
    kh, kw, Cin, Cout = weight_hwio.shape
    assert (kh, kw) == (3, 3) and Cin == C and Cout == C
    HW = H * W

    # Free, row-major reshapes only — no HBM transpose round trips, no HBM pad.
    x_flat = x_nchw.reshape(N, C, HW)                       # (N, C, H*W)
    w_mat = jnp.transpose(weight_hwio.reshape(9 * Cin, Cout))  # (Cout, 9*Cin), k=(dy,dx,ci)
    b_col = bias.reshape(Cout, 1)

    kernel = functools.partial(
        _resblock_kernel, H=H, W=W, Cin=Cin, Cout=Cout, mxu_dtype=mxu_dtype
    )

    out_flat = pl.pallas_call(
        kernel,
        out_shape=jax.ShapeDtypeStruct((N, Cout, HW), x_nchw.dtype),
        grid_spec=pltpu.PrefetchScalarGridSpec(
            num_scalar_prefetch=0,
            grid=(N,),
            in_specs=[
                pl.BlockSpec((1, C, HW), lambda n: (n, 0, 0)),        # single x read
                pl.BlockSpec((Cout, 9 * Cin), lambda n: (0, 0)),      # weights (resident)
                pl.BlockSpec((Cout, 1), lambda n: (0, 0)),            # bias
            ],
            out_specs=pl.BlockSpec((1, Cout, HW), lambda n: (n, 0, 0)),
        ),
        compiler_params=pltpu.CompilerParams(
            dimension_semantics=("parallel",),
            vmem_limit_bytes=32 * 1024 * 1024,
        ),
    )(x_flat, w_mat, b_col)

    return out_flat.reshape(N, Cout, H, W)                  # free reshape back to NCHW


def _reference(x_nchw, weight_hwio, bias):
    x_nhwc = jnp.transpose(x_nchw, (0, 2, 3, 1))
    y = lax.conv_general_dilated(
        x_nhwc, weight_hwio, window_strides=(1, 1), padding="SAME",
        dimension_numbers=("NHWC", "HWIO", "NHWC"),
    )
    y = jnp.maximum(y + bias.reshape(1, 1, 1, -1), 0.0) + x_nhwc
    return jnp.transpose(y, (0, 3, 1, 2))


if __name__ == "__main__":
    key = jax.random.PRNGKey(0)
    k_x, k_w, k_b = jax.random.split(key, 3)

    N, C, H, W = 2, 4, 16, 16   # in_ch == out_ch == 4 (required by the residual add)
    x = jax.random.normal(k_x, (N, C, H, W), dtype=jnp.float32)
    weight = jax.random.normal(k_w, (3, 3, C, C), dtype=jnp.float32) * 0.1
    bias = jax.random.normal(k_b, (C,), dtype=jnp.float32) * 0.1

    out = resblock_pallas(x, weight, bias)
    out = jax.block_until_ready(out)

    ref = _reference(x, weight, bias)
    assert out.shape == (N, C, H, W)
    assert bool(jnp.allclose(out, ref, atol=1e-4, rtol=1e-4))

    print("KERNEL_OK")
</pallas_src>

<mosaic_0001>
module attributes {stable_mosaic.version = 11 : i64} {
  func.func @_resblock_kernel(%arg0: i32, %arg1: memref<1x4x256xf32, #tpu.memory_space<vmem>>, %arg2: memref<4x36xf32, #tpu.memory_space<vmem>>, %arg3: memref<4x1xf32, #tpu.memory_space<vmem>>, %arg4: memref<1x4x256xf32, #tpu.memory_space<vmem>>) attributes {dimension_semantics = [#tpu.dimension_semantics<parallel>], iteration_bounds = array<i64: 2>, scalar_prefetch = 0 : i64, scratch_operands = 0 : i64, tpu.core_type = #tpu.core_type<tc>, window_params = [{transform_indices = @transform_0, window_bounds = array<i64: 1, 4, 256>}, {pipeline_mode = #tpu.pipeline_mode<synchronous>, transform_indices = @transform_1, window_bounds = array<i64: 4, 36>}, {pipeline_mode = #tpu.pipeline_mode<synchronous>, transform_indices = @transform_2, window_bounds = array<i64: 4, 1>}, {transform_indices = @transform_3, window_bounds = array<i64: 1, 4, 256>}]} {
    %c0 = arith.constant 0 : index
    %c0_0 = arith.constant 0 : index
    %c0_1 = arith.constant 0 : index
    %0 = vector.load %arg1[%c0, %c0_0, %c0_1] : memref<1x4x256xf32, #tpu.memory_space<vmem>>, vector<1x4x256xf32>
    %1 = vector.shape_cast %0 : vector<1x4x256xf32> to vector<4x256xf32>
    %2 = tpu.iota {dimensions = array<i32: 1>} : vector<1x256xi32>
    %c16_i32 = arith.constant 16 : i32
    %c0_i32 = arith.constant 0 : i32
    %3 = arith.cmpi eq, %c16_i32, %c0_i32 : i32
    %c1_i32 = arith.constant 1 : i32
    %4 = arith.select %3, %c1_i32, %c16_i32 : i32
    %5 = vector.broadcast %4 : i32 to vector<1x256xi32>
    %6 = arith.remsi %2, %5 : vector<1x256xi32>
    %c0_i32_2 = arith.constant 0 : i32
    %7 = vector.broadcast %c0_i32_2 : i32 to vector<1x256xi32>
    %8 = arith.cmpi ne, %6, %7 : vector<1x256xi32>
    %c0_i32_3 = arith.constant 0 : i32
    %9 = vector.broadcast %c0_i32_3 : i32 to vector<1x256xi32>
    %10 = arith.cmpi slt, %6, %9 : vector<1x256xi32>
    %c0_i32_4 = arith.constant 0 : i32
    %11 = arith.cmpi slt, %4, %c0_i32_4 : i32
    %12 = vector.broadcast %11 : i1 to vector<1x256xi1>
    %13 = vector.broadcast %12 : vector<1x256xi1> to vector<1x256xi1>
    %14 = arith.xori %10, %13 : vector<1x256xi1>
    %15 = arith.andi %14, %8 : vector<1x256xi1>
    %16 = vector.broadcast %4 : i32 to vector<1x256xi32>
    %17 = arith.addi %6, %16 : vector<1x256xi32>
    %18 = arith.select %15, %17, %6 : vector<1x256xi1>, vector<1x256xi32>
    %cst = arith.constant 0.000000e+00 : f32
    %19 = vector.broadcast %cst : f32 to vector<4x17xf32>
    %20 = vector.extract_strided_slice %1 {offsets = [0, 0], sizes = [4, 239], strides = [1, 1]} : vector<4x256xf32> to vector<4x239xf32>
    %21 = tpu.concatenate %19, %20 in 1 : vector<4x17xf32>, vector<4x239xf32> -> vector<4x256xf32>
    %c1_i32_5 = arith.constant 1 : i32
    %22 = vector.broadcast %c1_i32_5 : i32 to vector<1x256xi32>
    %23 = arith.cmpi sge, %18, %22 : vector<1x256xi32>
    %cst_6 = arith.constant 0.000000e+00 : f32
    %24 = vector.broadcast %cst_6 : f32 to vector<4x256xf32>
    %25 = vector.shape_cast %23 : vector<1x256xi1> to vector<1x256xi1>
    %26 = vector.broadcast %25 : vector<1x256xi1> to vector<4x256xi1>
    %27 = arith.select %26, %21, %24 : vector<4x256xi1>, vector<4x256xf32>
    %cst_7 = arith.constant 0.000000e+00 : f32
    %28 = vector.broadcast %cst_7 : f32 to vector<4x16xf32>
    %29 = vector.extract_strided_slice %1 {offsets = [0, 0], sizes = [4, 240], strides = [1, 1]} : vector<4x256xf32> to vector<4x240xf32>
    %30 = tpu.concatenate %28, %29 in 1 : vector<4x16xf32>, vector<4x240xf32> -> vector<4x256xf32>
    %cst_8 = arith.constant 0.000000e+00 : f32
    %31 = vector.broadcast %cst_8 : f32 to vector<4x15xf32>
    %32 = vector.extract_strided_slice %1 {offsets = [0, 0], sizes = [4, 241], strides = [1, 1]} : vector<4x256xf32> to vector<4x241xf32>
    %33 = tpu.concatenate %31, %32 in 1 : vector<4x15xf32>, vector<4x241xf32> -> vector<4x256xf32>
    %c15_i32 = arith.constant 15 : i32
    %34 = vector.broadcast %c15_i32 : i32 to vector<1x256xi32>
    %35 = arith.cmpi slt, %18, %34 : vector<1x256xi32>
    %cst_9 = arith.constant 0.000000e+00 : f32
    %36 = vector.broadcast %cst_9 : f32 to vector<4x256xf32>
    %37 = vector.shape_cast %35 : vector<1x256xi1> to vector<1x256xi1>
    %38 = vector.broadcast %37 : vector<1x256xi1> to vector<4x256xi1>
    %39 = arith.select %38, %33, %36 : vector<4x256xi1>, vector<4x256xf32>
    %cst_10 = arith.constant 0.000000e+00 : f32
    %40 = vector.broadcast %cst_10 : f32 to vector<4x1xf32>
    %41 = vector.extract_strided_slice %1 {offsets = [0, 0], sizes = [4, 255], strides = [1, 1]} : vector<4x256xf32> to vector<4x255xf32>
    %42 = tpu.concatenate %40, %41 in 1 : vector<4x1xf32>, vector<4x255xf32> -> vector<4x256xf32>
    %c1_i32_11 = arith.constant 1 : i32
    %43 = vector.broadcast %c1_i32_11 : i32 to vector<1x256xi32>
    %44 = arith.cmpi sge, %18, %43 : vector<1x256xi32>
    %cst_12 = arith.constant 0.000000e+00 : f32
    %45 = vector.broadcast %cst_12 : f32 to vector<4x256xf32>
    %46 = vector.shape_cast %44 : vector<1x256xi1> to vector<1x256xi1>
    %47 = vector.broadcast %46 : vector<1x256xi1> to vector<4x256xi1>
    %48 = arith.select %47, %42, %45 : vector<4x256xi1>, vector<4x256xf32>
    %cst_13 = arith.constant 0.000000e+00 : f32
    %49 = vector.broadcast %cst_13 : f32 to vector<4x1xf32>
    %50 = vector.extract_strided_slice %1 {offsets = [0, 1], sizes = [4, 255], strides = [1, 1]} : vector<4x256xf32> to vector<4x255xf32>
    %51 = tpu.concatenate %50, %49 in 1 : vector<4x255xf32>, vector<4x1xf32> -> vector<4x256xf32>
    %c15_i32_14 = arith.constant 15 : i32
    %52 = vector.broadcast %c15_i32_14 : i32 to vector<1x256xi32>
    %53 = arith.cmpi slt, %18, %52 : vector<1x256xi32>
    %cst_15 = arith.constant 0.000000e+00 : f32
    %54 = vector.broadcast %cst_15 : f32 to vector<4x256xf32>
    %55 = vector.shape_cast %53 : vector<1x256xi1> to vector<1x256xi1>
    %56 = vector.broadcast %55 : vector<1x256xi1> to vector<4x256xi1>
    %57 = arith.select %56, %51, %54 : vector<4x256xi1>, vector<4x256xf32>
    %cst_16 = arith.constant 0.000000e+00 : f32
    %58 = vector.broadcast %cst_16 : f32 to vector<4x15xf32>
    %59 = vector.extract_strided_slice %1 {offsets = [0, 15], sizes = [4, 241], strides = [1, 1]} : vector<4x256xf32> to vector<4x241xf32>
    %60 = tpu.concatenate %59, %58 in 1 : vector<4x241xf32>, vector<4x15xf32> -> vector<4x256xf32>
    %c1_i32_17 = arith.constant 1 : i32
    %61 = vector.broadcast %c1_i32_17 : i32 to vector<1x256xi32>
    %62 = arith.cmpi sge, %18, %61 : vector<1x256xi32>
    %cst_18 = arith.constant 0.000000e+00 : f32
    %63 = vector.broadcast %cst_18 : f32 to vector<4x256xf32>
    %64 = vector.shape_cast %62 : vector<1x256xi1> to vector<1x256xi1>
    %65 = vector.broadcast %64 : vector<1x256xi1> to vector<4x256xi1>
    %66 = arith.select %65, %60, %63 : vector<4x256xi1>, vector<4x256xf32>
    %cst_19 = arith.constant 0.000000e+00 : f32
    %67 = vector.broadcast %cst_19 : f32 to vector<4x16xf32>
    %68 = vector.extract_strided_slice %1 {offsets = [0, 16], sizes = [4, 240], strides = [1, 1]} : vector<4x256xf32> to vector<4x240xf32>
    %69 = tpu.concatenate %68, %67 in 1 : vector<4x240xf32>, vector<4x16xf32> -> vector<4x256xf32>
    %cst_20 = arith.constant 0.000000e+00 : f32
    %70 = vector.broadcast %cst_20 : f32 to vector<4x17xf32>
    %71 = vector.extract_strided_slice %1 {offsets = [0, 17], sizes = [4, 239], strides = [1, 1]} : vector<4x256xf32> to vector<4x239xf32>
    %72 = tpu.concatenate %71, %70 in 1 : vector<4x239xf32>, vector<4x17xf32> -> vector<4x256xf32>
    %c15_i32_21 = arith.constant 15 : i32
    %73 = vector.broadcast %c15_i32_21 : i32 to vector<1x256xi32>
    %74 = arith.cmpi slt, %18, %73 : vector<1x256xi32>
    %cst_22 = arith.constant 0.000000e+00 : f32
    %75 = vector.broadcast %cst_22 : f32 to vector<4x256xf32>
    %76 = vector.shape_cast %74 : vector<1x256xi1> to vector<1x256xi1>
    %77 = vector.broadcast %76 : vector<1x256xi1> to vector<4x256xi1>
    %78 = arith.select %77, %72, %75 : vector<4x256xi1>, vector<4x256xf32>
    %79 = tpu.concatenate %27, %30, %39, %48, %1, %57, %66, %69, %78 in 0 : vector<4x256xf32>, vector<4x256xf32>, vector<4x256xf32>, vector<4x256xf32>, vector<4x256xf32>, vector<4x256xf32>, vector<4x256xf32>, vector<4x256xf32>, vector<4x256xf32> -> vector<36x256xf32>
    %c0_23 = arith.constant 0 : index
    %c0_24 = arith.constant 0 : index
    %80 = vector.load %arg2[%c0_23, %c0_24] : memref<4x36xf32, #tpu.memory_space<vmem>>, vector<4x36xf32>
    %cst_25 = arith.constant dense<0.000000e+00> : vector<4x256xf32>
    %81 = tpu.matmul %80, %79, %cst_25 {dimension_numbers = #tpu.dot_dimension_numbers<[1], [0], [0], [1], [0, 0, 1, 1], [], []>} : vector<4x36xf32>, vector<36x256xf32>, vector<4x256xf32> -> vector<4x256xf32>
    %c0_26 = arith.constant 0 : index
    %c0_27 = arith.constant 0 : index
    %82 = vector.load %arg3[%c0_26, %c0_27] : memref<4x1xf32, #tpu.memory_space<vmem>>, vector<4x1xf32>
    %83 = vector.broadcast %82 : vector<4x1xf32> to vector<4x256xf32>
    %84 = arith.addf %81, %83 : vector<4x256xf32>
    %cst_28 = arith.constant 0.000000e+00 : f32
    %85 = vector.broadcast %cst_28 : f32 to vector<4x256xf32>
    %86 = arith.maximumf %84, %85 : vector<4x256xf32>
    %87 = arith.addf %86, %1 : vector<4x256xf32>
    %c0_29 = arith.constant 0 : index
    %c0_30 = arith.constant 0 : index
    %c0_31 = arith.constant 0 : index
    %88 = vector.load %arg4[%c0_29, %c0_30, %c0_31] : memref<1x4x256xf32, #tpu.memory_space<vmem>>, vector<1x4x256xf32>
    %89 = vector.shape_cast %88 : vector<1x4x256xf32> to vector<4x256xf32>
    %90 = vector.shape_cast %87 : vector<4x256xf32> to vector<1x4x256xf32>
    tpu.vector_store %arg4[%c0_29, %c0_30, %c0_31], %90 {strides = array<i32>} : memref<1x4x256xf32, #tpu.memory_space<vmem>>, vector<1x4x256xf32>,
    return
  }
  func.func @transform_0(%arg0: i32) -> (i32, i32, i32) {
    %c0_i32 = arith.constant 0 : i32
    %c0_i32_0 = arith.constant 0 : i32
    %c0_i32_1 = arith.constant 0 : i32
    return %arg0, %c0_i32, %c0_i32_0 : i32, i32, i32
  }
  func.func @transform_1(%arg0: i32) -> (i32, i32) {
    %c0_i32 = arith.constant 0 : i32
    %c0_i32_0 = arith.constant 0 : i32
    %c0_i32_1 = arith.constant 0 : i32
    return %c0_i32, %c0_i32_0 : i32, i32
  }
  func.func @transform_2(%arg0: i32) -> (i32, i32) {
    %c0_i32 = arith.constant 0 : i32
    %c0_i32_0 = arith.constant 0 : i32
    %c0_i32_1 = arith.constant 0 : i32
    return %c0_i32, %c0_i32_0 : i32, i32
  }
  func.func @transform_3(%arg0: i32) -> (i32, i32, i32) {
    %c0_i32 = arith.constant 0 : i32
    %c0_i32_0 = arith.constant 0 : i32
    %c0_i32_1 = arith.constant 0 : i32
    return %arg0, %c0_i32, %c0_i32_0 : i32, i32, i32
  }
}

</mosaic_0001>

<bundles_post_ra>
// kernel: tpu_custom_call.1
= control target key start
LH: loop header
LB: loop body
LE: loop exit
PB: predicated region body
PF: predicated region fallthrough
CT: control target
= control target key end

     0   :  { %8 = vsyncpa [#allocation3], 0  ;;  %s1027_s0 = inlined_call_operand.hbm [shape: f32[2,4,256], index: 0, kind: input, shape index: {}]   ;;  %s1028_s1 = inlined_call_operand.vmem [shape: f32[4,36], index: 1, kind: input, shape index: {}]   ;;  %s1029_s2 = inlined_call_operand.vmem [shape: f32[4,1], index: 2, kind: input, shape index: {}]   ;;  %s1030_s3 = inlined_call_operand.hbm [shape: f32[2,4,256], index: 3, kind: output, shape index: {}]  }
   0x1   :  { %10 = vsyncpa [#allocation3 + $0x1], 0 }
   0x2   :  { %11 = vsyncpa [#allocation4], 0 }
   0x3   :  { %13 = vsyncpa [#allocation4 + $0x1], 0  ;;  %s776_s12 = smov 0   ;;  %s778_s13 = smov 0  }
   0x4   :  { %s780_s14 = smov 0   ;;  %s782_s15 = smov 0  }
   0x5 LB: > { %s797_s16 = sadd.s32 4294967295, %s742_s15   ;;  %s525_s17 = sadd.s32 4294967294, %s742_s15   ;;  %s742_s15 = sphi %s782_s15, %s1053_s15   ;;  %s738_s14 = sphi %s780_s14, %s1052_s14   ;;  %s734_s13 = sphi %s778_s13, %s1051_s13   ;;  %s730_s12 = sphi %s776_s12, %s1050_s12  }
   0x6   : > { %s801_s18 = sadd.s32 1, %s742_s15   ;;  %s26_s19 = sadd.s32 1, %s738_s14 }
   0x7   : > { %s23_s20 = ssub.s32 %s742_s15, %s801_s18  ;;  %p33_p0 = scmp.ne.s32.totalorder %s738_s14, %s734_s13 }
   0x8   : > { %p24_p1 = scmp.eq.s32.totalorder %s23_s20, 0  ;;  %p34_p2 = scmp.eq.s32.totalorder %s742_s15, 0 }
   0x9   : > { %p39_p3 = scmp.ne.s32.totalorder %s734_s13, %s730_s12  ;;  %p40_p4 = scmp.eq.s32.totalorder %s797_s16, 0 }
   0xa   : > { %s813_s21 = scalar_select %p24_p1, %s738_s14, %s26_s19  }
   0xb   : > { %p815_p5 = por %p34_p2, %p33_p0  ;;  %p819_p6 = por %p40_p4, %p39_p3 }
   0xc   : > { %p105_p7 = scmp.eq.s32.totalorder %s797_s16, 1  ;;  %p111_p8 = scmp.eq.s32.totalorder %s525_s17, 1 }
   0xd   : > { %p564_p10 = scmp.lt.s32.totalorder %s742_s15, 2  ;;  %s137_s26 = sand.u32 1, %s738_s14  }
   0xe   : > { %p826_p11 = por %p105_p7, %p33_p0  ;;  %p830_p12 = por %p111_p8, %p39_p3 }
   0xf   : > { %s542_s27 = sshll.u32 %s742_s15, 7  ;;  %s528_s28 = sshll.u32 %s137_s26, 3 }
  0x10   : > { %s1034_s24 = scalar_select %p826_p11, 1, 0 }
  0x11   : > { %s1035_s25 = scalar_select %p830_p12, 1, 0 }
  0x12   : > { %s839_s4 = scalar_lea.hbm %s1027_s0, %s542_s27  ;;  %s141_s5 = scalar_lea.vmem [#allocation2], %s528_s28 }
  0x13   : > { %s149_s6 = sshll.u32 %s141_s5, 4  ;;  %p843_p13 = pnand %p564_p10, %p815_p5  ;;  %s847_s6 = int_to_ptr.vmem [resolvable:$true] %s149_s6 }
  0x14   : > { %s138_s8 = scalar_lea.sflag [#allocation3], %s137_s26  ;;  %s646_s9 = scalar_lea.hbm %s839_s4, 128 }
  0x15   : > { %p647_p2 = scmp.ne.s32.totalorder %s839_s4, %s646_s9  ;;  %p648_p3 = pneg %p843_p13 }
  0x16   : > { %s651_s17 = scalar_lea.hbm %s1027_s0, 256  ;;  %p652_p5 = scmp.lt.u32.totalorder %s839_s4, %s1027_s0 }
  0x17   : > { %p649_p4 = pnand %p648_p3, %p647_p2  ;;  %p653_p8 = scmp.lt.u32.totalorder %s651_s17, %s646_s9 }
  0x18   : > { %p655_p9 = scmp.lt.u32.totalorder %s646_s9, %s839_s4 }
  0x19   : > { %p650_p7 = pneg %p649_p4  ;;  %p654_p10 = por %p653_p8, %p652_p5 }
  0x1b   : > { %p656_p0 = por %p655_p9, %p654_p10 }
  0x1d   : > { %p657_p1 = pnand %p656_p0, %p650_p7 }
  0x1f   : > { %660 = shalt.err (!%p657_p1)
}
  0x20   : > { %s661_s22 = scalar_lea.vmem %s847_s6, 128  ;;  %s744_s26 = smov [#allocation2]  }
  0x21   : > { %p662_p2 = scmp.ne.s32.totalorder %s847_s6, %s661_s22  ;;  %s666_s27 = sshll.u32 %s744_s26, 4  ;;  %s667_s27 = int_to_ptr.vmem [resolvable:$false] %s666_s27 }
  0x22   : > { %s668_s28 = scalar_lea.vmem %s667_s27, 256  ;;  %p669_p11 = scmp.lt.s32.totalorder %s847_s6, %s667_s27 }
  0x23   : > { %p664_p4 = pnand %p662_p2, %p648_p3  ;;  %p670_p5 = scmp.lt.s32.totalorder %s668_s28, %s661_s22 }
  0x25   : > { %p665_p12 = pneg %p664_p4  ;;  %p671_p8 = por %p670_p5, %p669_p11 }
  0x27   : > { %p672_p9 = pnand %p671_p8, %p665_p12 }
  0x29   : > { %675 = shalt.err (!%p672_p9)
}
  0x2a   : > { %559 = dma.hbm_to_vmem [thread:$0]  (!%p843_p13), %s839_s4, 128, %s847_s6, %s138_s8  }
  0x2b   : > { %p1037_p0 = scmp.lt.s32.totalorder %s742_s15, 3  ;;  %p1038_p1 = scmp.ge.s32.totalorder %s742_s15, 1 }
  0x2d   : > { %p155_p3 = pnand %p1038_p1, %p1037_p0 }
  0x2e   : > { %s881_s29 = sand.u32 (!%p155_p3), 1, %s734_s13  }
  0x2f   : > { %158 = sbr.rel (%p155_p3) target bundleno = 435 (0x1b3), region = 32  ;;  %s532_s30 = sshll.u32 (!%p155_p3), %s881_s29, 3 }
  0x30   : > { %s161_s5 = scalar_lea.sflag (!%p155_p3), [#allocation3], %s881_s29  ;;  %s164_s7 = scalar_lea.vmem (!%p155_p3), [#allocation2], %s532_s30 }
  0x36   : > { %721 = dma.done.wait (%p819_p6), %s161_s5, 128  }
  0x37   : > { %723 = vsyncadd (%p819_p6), %s161_s5, 4294967168  ;;  %v891_v0 = vld [vmem:[%s164_s7] sm:$0xff]  ;;  %s745_s4 = smov 17   ;;  %s746_s6 = smov 1   ;;  %v753_v4 = vmov 0.0   ;;  %v754_v6 = vmov 0   ;;  %v188_v7 = vlaneseq }
  0x38   : > { %v895_v1 = vcombine.high %v891_v0, %v891_v0  ;;  %s747_s8 = smov 15   ;;  %s748_s9 = smov 16   ;;  %424 = vmatprep.mubr.f32.mxu0 %v753_v4  ;;  %v344_v5 = vld [vmem:[%s1029_s2] sm:$0xf]  ;;  %643 = vset.pattern.permute.xlu1 %v754_v6  ;;  %vm221_vm0 = vcmask 138240   ;;  %vm263_vm2 = vcmask 7168  }
  0x39   : > { %s749_s23 = smov 127   ;;  %s750_s10 = smov 112   ;;  %644 = vset.pattern.permute.xlu0 %v754_v6  ;;  %v189_v8 = vand.u32 127, %v188_v7  ;;  %vm246_vm4 = vcmask 121856   ;;  %vm238_vm5 = vcmask 130048   ;;  %vm274_vm7 = vcmask 1039360  }
  0x3a   : > { %v618_v2 = vpack.i.bf16 %v895_v1, %v891_v0  ;;  %v628_v3 = vpack.i.bf16 %v891_v0, %v895_v1  ;;  %s751_s11 = smov 113   ;;  %s752_s17 = smov 111   ;;  %vm334_vm8 = vcmask 1043456   ;;  %vm296_vm9 = vcmask 916480  }
  0x3b   : > { %v190_v9 = vadd.s32 128, %v189_v8  ;;  %v195_v10 = vand.u32 15, %v189_v8  ;;  %vm285_vm11 = vcmask 924672   ;;  %vm304_vm12 = vcmask 908288   ;;  %s543_s27 = sshll.u32 %s797_s16, 7  ;;  %s186_s28 = scalar_lea.vmem [#allocation5], %s532_s30 }
  0x3c   : > { %619 = vrot.lane.b32.xlu1 %v618_v2, %s745_s4  ;;  %609 = vrot.lane.b32.xlu0 %v618_v2, %s746_s6  ;;  %vm350_vm13 = vcmask 293888   ;;  %s455_s5 = sshll.u32 %s186_s28, 4  ;;  %s983_s6 = scalar_lea.hbm %s1030_s3, %s543_s27  ;;  %s985_s5 = int_to_ptr.vmem [resolvable:$true] %s455_s5 }
  0x3d   : > { %v202_v11 = vand.u32 15, %v190_v9  ;;  %vm906_vm1 = vcmp.ge.s32.totalorder %v195_v10, 1  ;;  %vm923_vm10 = vcmp.lt.s32.totalorder %v195_v10, 15  ;;  %p1047_p11 = scmp.ne.s32.totalorder %s1034_s24, 0  ;;  %s755_s16 = smov [#allocation5]  }
  0x3e   : > { %s680_s30 = sshll.u32 %s755_s16, 4  ;;  %s681_s30 = int_to_ptr.vmem [resolvable:$false] %s680_s30 }
  0x3f   : > { %vm910_vm3 = vcmp.ge.s32.totalorder %v202_v11, 1  ;;  %vm914_vm6 = vcmp.lt.s32.totalorder %v202_v11, 15  ;;  %p683_p7 = scmp.lt.s32.totalorder %s985_s5, %s681_s30 }
  0x40   : > { %624 = vrot.lane.b32.xlu1 %v618_v2, %s747_s8  ;;  %614 = vrot.lane.b32.xlu0 %v618_v2, %s748_s9  ;;  %s441_s8 = scalar_lea.sflag [#allocation4], %s881_s29  ;;  %s676_s9 = scalar_lea.vmem %s985_s5, 128 }
  0x41   : > { %p677_p6 = scmp.ne.s32.totalorder %s985_s5, %s676_s9 }
  0x43   : > { %p678_p12 = pnand %p677_p6, %p1047_p11 }
  0x44   : > { %629 = vrot.lane.b32.xlu0 %v628_v3, %s749_s23  ;;  %634 = vrot.lane.b32.xlu1 %v628_v3, %s750_s10  ;;  %s682_s23 = scalar_lea.vmem %s681_s30, 256 }
  0x45   : > { %p679_p13 = pneg %p678_p12  ;;  %p684_p10 = scmp.lt.s32.totalorder %s682_s23, %s676_s9 }
  0x47   : > { %p685_p2 = por %p684_p10, %p683_p7 }
  0x48   : > { %639 = vrot.lane.b32.xlu0 %v628_v3, %s751_s11  ;;  %302 = vrot.lane.b32.xlu1 %v895_v1, %s752_s17 }
  0x49   : > { %p686_p4 = pnand %p685_p2, %p679_p13 }
  0x4c   : > { %300 = vrot.lane.b32.xlu0 %v891_v0, %s752_s17  ;;  %347 = vperm.xlu1 %643, %v344_v5  }
  0xae   : > { %v620_v12 = vpop.permute.xlu1 %619  ;;  %v610_v14 = vpop.permute.xlu0 %609 }
  0xaf   : > { %v622_v16 = vunpack.i.h.bf16 %v620_v12  ;;  %v621_v17 = vunpack.i.l.bf16 %v620_v12  ;;  %v612_v18 = vunpack.i.h.bf16 %v610_v14  ;;  %v611_v19 = vunpack.i.l.bf16 %v610_v14 }
  0xb1   : > { %v264_v21 = vsel %vm263_vm2, %v611_v19, %v612_v18  ;;  %v267_v22 = vsel %vm263_vm2, 0.0, %v611_v19  ;;  %v222_v23 = vsel %vm221_vm0, %v621_v17, %v622_v16  ;;  %v225_v32 = vsel %vm221_vm0, 0.0, %v621_v17 }
  0xb2   : > { %v268_v24 = vsel %vm906_vm1, %v267_v22, 0.0  ;;  %v625_v25 = vpop.permute.xlu1 %624  ;;  %v615_v26 = vpop.permute.xlu0 %614  ;;  %v269_v27 = vsel %vm910_vm3, %v264_v21, 0.0  ;;  %v233_v34 = vsel %vm910_vm3, %v222_v23, 0.0  ;;  %v232_v52 = vsel %vm906_vm1, %v225_v32, 0.0 }
  0xb3   : > { %v627_v29 = vunpack.i.h.bf16 %v625_v25  ;;  %v626_v30 = vunpack.i.l.bf16 %v625_v25  ;;  %v617_v31 = vunpack.i.h.bf16 %v615_v26  ;;  %v616_v33 = vunpack.i.l.bf16 %v615_v26  ;;  %v343_v26 = vld [vmem:[%s1028_s1] sm:$0xf] }
  0xb4   : > { %v318_v35 = vrot.slane %v268_v24, 4  ;;  %v319_v38 = vrot.slane %v269_v27, 4 }
  0xb5   : > { %v250_v36 = vsel %vm246_vm4, 0.0, %v626_v30  ;;  %v247_v37 = vsel %vm246_vm4, %v626_v30, %v627_v29  ;;  %v241_v39 = vsel %vm238_vm5, 0.0, %v616_v33  ;;  %v239_v42 = vsel %vm238_vm5, %v616_v33, %v617_v31 }
  0xb6   : > { %v630_v40 = vpop.permute.xlu0 %629  ;;  %v635_v41 = vpop.permute.xlu1 %634  ;;  %v258_v43 = vsel %vm914_vm6, %v247_v37, 0.0  ;;  %v257_v44 = vsel %vm923_vm10, %v250_v36, 0.0  ;;  %v312_v45 = vrot.slane %v241_v39, 4  ;;  %v313_v50 = vrot.slane %v239_v42, 4 }
  0xb7   : > { %v632_v46 = vunpack.i.h.bf16 %v630_v40  ;;  %v631_v47 = vunpack.i.l.bf16 %v630_v40  ;;  %v637_v48 = vunpack.i.h.bf16 %v635_v41  ;;  %v636_v49 = vunpack.i.l.bf16 %v635_v41 }
  0xb8   : > { %v338_v51 = vsel %vm334_vm8, %v258_v43, %v319_v38  ;;  %v335_v55 = vsel %vm334_vm8, %v232_v52, %v312_v45  ;;  %v337_v56 = vsel %vm334_vm8, %v257_v44, %v318_v35  ;;  %v336_v61 = vsel %vm334_vm8, %v233_v34, %v313_v50 }
  0xb9   : > { %v275_v53 = vsel %vm274_vm7, %v632_v46, %v631_v47  ;;  %v278_v54 = vsel %vm274_vm7, %v631_v47, 0.0  ;;  %v297_v58 = vsel %vm296_vm9, %v637_v48, %v636_v49  ;;  %v299_v59 = vsel %vm296_vm9, %v636_v49, 0.0 }
  0xba   : > { %v280_v57 = vsel %vm914_vm6, %v278_v54, 0.0  ;;  %v640_v60 = vpop.permute.xlu0 %639  ;;  %v330_v63 = vrot.slane %v297_v58, 4  ;;  %v331_v2 = vrot.slane %v299_v59, 4  ;;  %v544_v5 = vpack.c.bf16 %v338_v51, %v336_v61  ;;  %v303_v8 = vpop.permute.xlu1 %302 }
  0xbb   : > { %v326_v62 = vrot.slane %v280_v57, 4  ;;  %v642_v3 = vunpack.i.h.bf16 %v640_v60  ;;  %v641_v4 = vunpack.i.l.bf16 %v640_v60  ;;  %v279_v6 = vsel %vm923_vm10, %v275_v53, 0.0 }
  0xbc   : > { %v546_v7 = vpack.c.bf16 %v337_v56, %v335_v55  ;;  %v325_v9 = vrot.slane %v279_v6, 4  ;;  %545 = vmatprep.subr.bf16.mxu0 %v544_v5  ;;  %v308_v14 = vsel %vm304_vm12, %v303_v8, 0.0 }
  0xbd   : > { %v286_v10 = vsel %vm285_vm11, %v642_v3, %v641_v4  ;;  %v289_v11 = vsel %vm285_vm11, %v641_v4, 0.0  ;;  %v340_v18 = vsel %vm334_vm8, %v895_v1, %v326_v62  ;;  %v310_v24 = vsel %vm914_vm6, %v308_v14, 0.0 }
  0xbe   : > { %v291_v12 = vsel %vm910_vm3, %v289_v11, 0.0  ;;  %547 = vmatpush1.bf16.msra.mxu0 %v546_v7  ;;  %v301_v16 = vpop.permute.xlu0 %300  ;;  %v290_v17 = vsel %vm906_vm1, %v286_v10, 0.0  ;;  %v339_v21 = vsel %vm334_vm8, %v891_v0, %v325_v9 }
  0xbf   : > { %v342_v19 = vsel %vm334_vm8, %v291_v12, %v331_v2  ;;  %v341_v22 = vsel %vm334_vm8, %v290_v17, %v330_v63  ;;  %v305_v25 = vsel %vm304_vm12, %v301_v16, %v303_v8 }
  0xc0   : > { %v548_v23 = vpack.c.bf16 %v342_v19, %v340_v18  ;;  %v550_v15 = vpack.c.bf16 %v341_v22, %v339_v21  ;;  %v309_v13 = vsel %vm923_vm10, %v305_v25, 0.0 }
  0xc2   : > { %549 = vmatprep.subr.bf16.mxu0 %v548_v23 }
  0xc3   : > { %551 = vmatpush1.bf16.msra.mxu0 %v550_v15 }
  0xc4   : > { %534 = vmatprep.subr.msk.mxu0 %vm334_vm8, %v310_v24 }
  0xc7   : > { %535 = vmatpush1.msk.msra.mxu0 %vm334_vm8, %v309_v13 }
  0xc8   : > { %536 = vmatmul.mubr.msk.f32.vlgmr.msra.gmra.mrb[0].mxu0 %vm350_vm13, %v343_v26 }
  0xcb   : > { %v348_v20 = vpop.permute.xlu1 %347 }
 0x19b   : > { %v426_v27 = vpop.f32.mrb[0].mxu0 }
 0x19c   : > { %v427_v29 = vadd.f32 %v426_v27, %v348_v20  ;;  %v428_v30 = vpop.f32.mrb[1].mxu0 }
 0x19d   : > { %v429_v31 = vadd.f32 %v428_v30, %v348_v20 }
 0x19e   : > { %v431_v28 = vmax.f32 %v427_v29, 0.0 }
 0x19f   : > { %v432_v32 = vmax.f32 %v429_v31, 0.0 }
 0x1a0   : > { %v433_v33 = vadd.f32 %v431_v28, %v891_v0 }
 0x1a1   : > { %v434_v34 = vadd.f32 %v432_v32, %v895_v1 }
 0x1a3   : > { %v437_v35 = vcombine.low %v433_v33, %v434_v34 }
 0x1a5   : > { %439 = vst [vmem:[%s186_s28] sm:$0xff] %v437_v35 }
 0x1a6   : > { %689 = shalt.err (!%p686_p4)
}
 0x1a7   : > { %s690_s29 = scalar_lea.hbm %s983_s6, 128  ;;  %s694_s17 = scalar_lea.hbm %s1030_s3, 256 }
 0x1a8   : > { %p691_p5 = scmp.ne.s32.totalorder %s983_s6, %s690_s29  ;;  %p695_p0 = scmp.lt.u32.totalorder %s983_s6, %s1030_s3 }
 0x1a9   : > { %p696_p1 = scmp.lt.u32.totalorder %s694_s17, %s690_s29  ;;  %p698_p6 = scmp.lt.u32.totalorder %s690_s29, %s983_s6 }
 0x1aa   : > { %p692_p8 = pnand %p691_p5, %p1047_p11 }
 0x1ab   : > { %p697_p3 = por %p696_p1, %p695_p0 }
 0x1ac   : > { %p693_p9 = pneg %p692_p8 }
 0x1ad   : > { %p699_p12 = por %p698_p6, %p697_p3 }
 0x1af   : > { %p700_p13 = pnand %p699_p12, %p693_p9 }
 0x1b1   : > { %703 = shalt.err (!%p700_p13)
}
 0x1b2   : > { %554 = dma.vmem_to_hbm [thread:$0]  (%p1047_p11), %s985_s5, 128, %s983_s6, %s441_s8  }
 0x1b3 PF: > { %s467_s22 = sand.u32 1, %s730_s12   ;;  %p1048_p7 = scmp.ne.s32.totalorder %s1035_s25, 0 }
 0x1b4   : > { %p1049_p10 = scmp.ge.s32.totalorder %s742_s15, 2  ;;  %s468_s26 = scalar_lea.sflag [#allocation4], %s467_s22 }
 0x1b6   : > { %p561_p2 = pnand %p1049_p10, %p1048_p7 }
 0x1b8   : > { %725 = dma.done.wait (!%p561_p2), %s468_s26, 128  }
 0x1b9   : > { %727 = vsyncadd (!%p561_p2), %s468_s26, 4294967168  ;;  %p16_p4 = scmp.ge.s32.totalorder %s801_s18, 4   ;;  %s1050_s12 = smov %s734_s13 }
 0x1ba   : > { %s1051_s13 = smov %s738_s14  ;;  %s1052_s14 = smov %s813_s21 }
 0x1bb   : > { %s1053_s15 = smov %s801_s18  ;;  %18 = sbr.rel (!%p16_p4) target bundleno = 5 (0x5), region = 77 }
 0x1c2   :  { %473 = vsyncpa [#allocation3], 1 }
 0x1c3   :  { %475 = vsyncpa [#allocation3 + $0x1], 1 }
 0x1c4   :  { %476 = vsyncpa [#allocation4], 1 }
 0x1c5   :  { %478 = vsyncpa [#allocation4 + $0x1], 1 }

</bundles_post_ra>
